<compile_context>
chip_gen: v5e
topology: v5e:2x2
jax: 0.10.0
libtpu: 0.0.40
codegen_flags: <defaults>
</compile_context>

<pallas_src>
import jax
import jax.numpy as jnp
from jax.experimental import pallas as pl
from jax.experimental.pallas import tpu as pltpu


def _patch_embed_kernel(x_ref, w_ref, pos_ref, o_ref):
    # x_ref: (TM, K) bf16 | w_ref: (K, N) bf16 (resident) | pos_ref: (TM, N) f32
    acc = jnp.dot(x_ref[...], w_ref[...], preferred_element_type=jnp.float32)
    o_ref[...] = (acc + pos_ref[...]).astype(o_ref.dtype)


def _vmem_capacity_bytes(default_bytes=64 << 20):
    """Per-core VMEM capacity; conservative (v7x-sized) default if the query fails."""
    try:
        return int(pltpu.get_tpu_info().vmem_capacity_bytes)
    except Exception:
        return default_bytes


def _pick_tile_rows(L, K, N, out_itemsize, vmem_budget_bytes, max_rows=1024):
    """Largest token-tile TM fitting the VMEM budget; prefers 256/128 alignment."""
    # Double-buffered per-row bytes: x(bf16) + pos(f32) + out(out_dtype).
    per_row = 2 * (K * 2) + 2 * (N * 4) + 2 * (N * out_itemsize)
    resident = K * N * 2  # weight stays in VMEM
    cap = max(8, (vmem_budget_bytes - resident) // max(per_row, 1))
    cap = int(min(cap, max_rows, L))
    if cap >= L:
        return L  # full dim is always a legal block shape
    for align in (256, 128, 8):  # v7x MXU, v5e MXU/vst, minimum sublane tiling
        tm = (cap // align) * align
        if tm >= align:
            return tm
    return L  # L < 8: fall back to the full dimension (legal block shape)


def patch_embed_projection(xp, w, pos, *, out_dtype=jnp.float32,
                           compute_dtype=jnp.bfloat16):
    """xp: (B, L, K) patch tokens; w: (K, N); pos: (L, N) (bias already folded) -> (B, L, N)."""
    B, L, K = xp.shape
    Kw, N = w.shape
    assert K == Kw and pos.shape == (L, N)

    out_itemsize = jnp.dtype(out_dtype).itemsize
    vmem_cap = _vmem_capacity_bytes()
    TM = _pick_tile_rows(L, K, N, out_itemsize, vmem_cap // 2)
    num_j = pl.cdiv(L, TM)
    # Keep both v7x TensorCores busy: make sure there are at least 2 parallel grid cells.
    while num_j * B < 2 and TM > 8:
        TM = max(8, ((TM // 2) // 8) * 8)
        num_j = pl.cdiv(L, TM)
    grid = (num_j, B)  # token-tile axis outer, batch inner -> pos tile reused across B

    xp_c = xp if xp.dtype == compute_dtype else xp.astype(compute_dtype)
    w_c = w if w.dtype == compute_dtype else w.astype(compute_dtype)
    pos_f = pos if pos.dtype == jnp.float32 else pos.astype(jnp.float32)

    # VMEM limit derived from the SAME accounting used for tile selection.
    per_row = 2 * (K * 2) + 2 * (N * 4) + 2 * (N * out_itemsize)
    step_bytes = K * N * 2 + TM * per_row
    vmem_limit = int(min(max(int(1.5 * step_bytes), 16 << 20),
                         max(vmem_cap - (8 << 20), 16 << 20)))

    return pl.pallas_call(
        _patch_embed_kernel,
        out_shape=jax.ShapeDtypeStruct((B, L, N), out_dtype),
        grid=grid,
        in_specs=[
            pl.BlockSpec((None, TM, K), lambda j, bb: (bb, j, 0)),  # x tokens (tiled)
            pl.BlockSpec((K, N), lambda j, bb: (0, 0)),             # weight   (resident)
            pl.BlockSpec((TM, N), lambda j, bb: (j, 0)),            # pos+bias (reused over B)
        ],
        out_specs=pl.BlockSpec((None, TM, N), lambda j, bb: (bb, j, 0)),
        compiler_params=pltpu.CompilerParams(
            dimension_semantics=("parallel", "parallel"),
            vmem_limit_bytes=vmem_limit,
        ),
    )(xp_c, w_c, pos_f)


class EmbeddingProjectionPallas:
    def __init__(self, image_size, frames, in_channels, hidden_dim, patch_size,
                 dropout, key, out_dtype=jnp.float32, compute_dtype=jnp.bfloat16):
        self.image_size = image_size
        self.frames = frames
        self.in_channels = in_channels
        self.hidden_dim = hidden_dim
        self.patch_size = patch_size
        self.num_patches = (image_size // patch_size) ** 2
        self.dropout = dropout
        self.out_dtype = out_dtype
        self.compute_dtype = compute_dtype

        K = in_channels * patch_size * patch_size
        kw, kb = jax.random.split(key)
        # PyTorch Conv3d default init: U(-1/sqrt(fan_in), 1/sqrt(fan_in)).
        bound = 1.0 / (K ** 0.5)
        conv_w = jax.random.uniform(
            kw, (hidden_dim, in_channels, 1, patch_size, patch_size),
            jnp.float32, -bound, bound)
        # Flatten the conv to a GEMM matrix: (K, N) with K ordered (c, ph, pw).
        self.w = conv_w.reshape(hidden_dim, K).T
        self.w_c = self.w.astype(compute_dtype)          # hoisted cast (done once)
        self.b = jax.random.uniform(kb, (hidden_dim,), jnp.float32, -bound, bound)
        # nn.Parameter(torch.ones(...)) inits.
        self.temporal_pos_emb = jnp.ones((frames, hidden_dim), jnp.float32)
        self.spatial_pos_emb = jnp.ones((self.num_patches, hidden_dim), jnp.float32)
        # Precompute positional embedding + conv bias once (parameters are static).
        L = frames * self.num_patches
        self.pos_bias = ((self.temporal_pos_emb[:, None, :]
                          + self.spatial_pos_emb[None, :, :]).reshape(L, hidden_dim)
                         + self.b[None, :])

    def _im2col(self, x):
        """(B, C, F, H, W) -> (B, F*num_patches, C*p*p) bf16 tokens in conv (c, ph, pw) order."""
        B, C, F, H, W = x.shape
        p = self.patch_size
        hp, wp = H // p, W // p
        xt = x.reshape(B, C, F, hp, p, wp, p)
        xt = jnp.transpose(xt, (0, 2, 3, 5, 1, 4, 6))   # (B, F, hp, wp, C, p, p)
        # Cast here so XLA fuses transpose+convert in a single pass over the input.
        return xt.reshape(B, F * hp * wp, C * p * p).astype(self.compute_dtype)

    def __call__(self, x):
        xp = self._im2col(x)                                            # (B, L, K) bf16
        y = patch_embed_projection(xp, self.w_c, self.pos_bias,
                                   out_dtype=self.out_dtype,
                                   compute_dtype=self.compute_dtype)    # (B, L, N)
        # TODO(synk): training-mode nn.Dropout (pltpu.prng_* masking) not implemented;
        # this matches eval() / effectively dropout p == 0.
        return y


if __name__ == "__main__":
    image_size = 16
    frames = 2
    in_channels = 4
    hidden_dim = 32
    patch_size = 4
    dropout = 0.0

    key = jax.random.PRNGKey(0)
    k_param, k_x = jax.random.split(key)

    mod = EmbeddingProjectionPallas(image_size, frames, in_channels, hidden_dim,
                                    patch_size, dropout, k_param)

    B = 2
    x = jax.random.normal(
        k_x, (B, in_channels, frames, image_size, image_size), jnp.float32)

    out = jax.block_until_ready(mod(x))

    # Plain-JAX reference (same bf16 MXU inputs, f32 accumulation, fused pos+bias add).
    L = frames * mod.num_patches
    xp = mod._im2col(x)
    ref = jnp.einsum("blk,kn->bln", xp, mod.w_c, preferred_element_type=jnp.float32)
    ref = (ref + mod.pos_bias[None, :, :]).astype(jnp.float32)

    assert out.shape == (B, L, hidden_dim), out.shape
    assert jnp.allclose(out.astype(jnp.float32), ref, atol=1e-4, rtol=1e-4)
    print("KERNEL_OK")
</pallas_src>

<mosaic_0001>
module attributes {stable_mosaic.version = 11 : i64} {
  func.func @_patch_embed_kernel(%arg0: i32, %arg1: i32, %arg2: memref<1x32x64xbf16, #tpu.memory_space<vmem>>, %arg3: memref<64x32xbf16, #tpu.memory_space<vmem>>, %arg4: memref<32x32xf32, #tpu.memory_space<vmem>>, %arg5: memref<1x32x32xf32, #tpu.memory_space<vmem>>) attributes {dimension_semantics = [#tpu.dimension_semantics<parallel>, #tpu.dimension_semantics<parallel>], iteration_bounds = array<i64: 1, 2>, scalar_prefetch = 0 : i64, scratch_operands = 0 : i64, tpu.core_type = #tpu.core_type<tc>, window_params = [{transform_indices = @transform_0, window_bounds = array<i64: 1, 32, 64>}, {pipeline_mode = #tpu.pipeline_mode<synchronous>, transform_indices = @transform_1, window_bounds = array<i64: 64, 32>}, {transform_indices = @transform_2, window_bounds = array<i64: 32, 32>}, {transform_indices = @transform_3, window_bounds = array<i64: 1, 32, 32>}]} {
    %c0 = arith.constant 0 : index
    %c0_0 = arith.constant 0 : index
    %c0_1 = arith.constant 0 : index
    %0 = vector.load %arg2[%c0, %c0_0, %c0_1] : memref<1x32x64xbf16, #tpu.memory_space<vmem>>, vector<1x32x64xbf16>
    %1 = vector.shape_cast %0 : vector<1x32x64xbf16> to vector<32x64xbf16>
    %c0_2 = arith.constant 0 : index
    %c0_3 = arith.constant 0 : index
    %2 = vector.load %arg3[%c0_2, %c0_3] : memref<64x32xbf16, #tpu.memory_space<vmem>>, vector<64x32xbf16>
    %cst = arith.constant dense<0.000000e+00> : vector<32x32xf32>
    %3 = tpu.matmul %1, %2, %cst {dimension_numbers = #tpu.dot_dimension_numbers<[1], [0], [0], [1], [0, 0, 1, 1], [], []>} : vector<32x64xbf16>, vector<64x32xbf16>, vector<32x32xf32> -> vector<32x32xf32>
    %c0_4 = arith.constant 0 : index
    %c0_5 = arith.constant 0 : index
    %4 = vector.load %arg4[%c0_4, %c0_5] : memref<32x32xf32, #tpu.memory_space<vmem>>, vector<32x32xf32>
    %5 = arith.addf %3, %4 : vector<32x32xf32>
    %c0_6 = arith.constant 0 : index
    %c0_7 = arith.constant 0 : index
    %c0_8 = arith.constant 0 : index
    %6 = vector.load %arg5[%c0_6, %c0_7, %c0_8] : memref<1x32x32xf32, #tpu.memory_space<vmem>>, vector<1x32x32xf32>
    %7 = vector.shape_cast %6 : vector<1x32x32xf32> to vector<32x32xf32>
    %8 = vector.shape_cast %5 : vector<32x32xf32> to vector<1x32x32xf32>
    tpu.vector_store %arg5[%c0_6, %c0_7, %c0_8], %8 {strides = array<i32>} : memref<1x32x32xf32, #tpu.memory_space<vmem>>, vector<1x32x32xf32>,
    return
  }
  func.func @transform_0(%arg0: i32, %arg1: i32) -> (i32, i32, i32) {
    %c0_i32 = arith.constant 0 : i32
    %c0_i32_0 = arith.constant 0 : i32
    return %arg1, %arg0, %c0_i32 : i32, i32, i32
  }
  func.func @transform_1(%arg0: i32, %arg1: i32) -> (i32, i32) {
    %c0_i32 = arith.constant 0 : i32
    %c0_i32_0 = arith.constant 0 : i32
    %c0_i32_1 = arith.constant 0 : i32
    return %c0_i32, %c0_i32_0 : i32, i32
  }
  func.func @transform_2(%arg0: i32, %arg1: i32) -> (i32, i32) {
    %c0_i32 = arith.constant 0 : i32
    %c0_i32_0 = arith.constant 0 : i32
    return %arg0, %c0_i32 : i32, i32
  }
  func.func @transform_3(%arg0: i32, %arg1: i32) -> (i32, i32, i32) {
    %c0_i32 = arith.constant 0 : i32
    %c0_i32_0 = arith.constant 0 : i32
    return %arg1, %arg0, %c0_i32 : i32, i32, i32
  }
}

</mosaic_0001>

<bundles_post_ra>
// kernel: tpu_custom_call.1
= control target key start
LH: loop header
LB: loop body
LE: loop exit
PB: predicated region body
PF: predicated region fallthrough
CT: control target
= control target key end

     0   :  { %8 = vsyncpa [#allocation3], 0  ;;  %s797_s0 = inlined_call_operand.vmem [shape: bf16[2,32,64], index: 0, kind: input, shape index: {}]   ;;  %s798_s1 = inlined_call_operand.vmem [shape: bf16[64,32], index: 1, kind: input, shape index: {}]   ;;  %s799_s2 = inlined_call_operand.hbm [shape: f32[32,32], index: 2, kind: input, shape index: {}]   ;;  %s800_s3 = inlined_call_operand.hbm [shape: f32[2,32,32], index: 3, kind: output, shape index: {}]  }
   0x1   :  { %9 = vsyncpa [#allocation4], 0 }
   0x2   :  { %11 = vsyncpa [#allocation4 + $0x1], 0  ;;  %s681_s12 = smov 0   ;;  %s683_s13 = smov 0  }
   0x3   :  { %s685_s14 = smov 0   ;;  %s687_s15 = smov 0  }
   0x4   :  { %s689_s16 = smov 0   ;;  %s691_s17 = smov 0  }
   0x5 LB: > { %s419_s18 = sadd.s32 4294967295, %s654_s17   ;;  %s420_s19 = sadd.s32 4294967294, %s654_s17   ;;  %s654_s17 = sphi %s691_s17, %s17_s17   ;;  %s650_s16 = sphi %s689_s16, %s807_s16   ;;  %s646_s15 = sphi %s687_s15, %s806_s15   ;;  %s642_s14 = sphi %s685_s14, %s805_s14   ;;  %s638_s13 = sphi %s683_s13, %s804_s13   ;;  %s634_s12 = sphi %s681_s12, %s803_s12  }
   0x6   : > { %s26_s20 = sadd.s32 1, %s650_s16  ;;  %s113_s21 = sadd.s32 1, %s642_s14 }
   0x7   : > { %p27_p0 = scmp.ge.s32.totalorder %s26_s20, 2  ;;  %p123_p1 = scmp.ne.s32.totalorder %s642_s14, %s638_s13 }
   0x8   : > { %p124_p2 = scmp.eq.s32.totalorder %s419_s18, 1  ;;  %p129_p3 = scmp.ne.s32.totalorder %s638_s13, %s634_s12 }
   0x9   : > { %s809_s20 = smov (%p27_p0, %s26_s20), 0  ;;  %p130_p5 = scmp.eq.s32.totalorder %s420_s19, 1 }
   0xa   : > { %p721_p4 = por %p124_p2, %p123_p1  ;;  %s108_s23 = ssub.s32 %s650_s16, %s809_s20 }
   0xb   : > { %p421_p6 = scmp.ge.s32.totalorder %s654_s17, 1  ;;  %p111_p7 = scmp.eq.s32.totalorder %s108_s23, 0 }
   0xc   : > { %p728_p8 = por %p130_p5, %p129_p3  ;;  %p137_p9 = scmp.lt.s32.totalorder %s654_s17, 3 }
   0xd   : > { %s734_s25 = scalar_select %p111_p7, %s642_s14, %s113_s21  }
   0xe   : > { %p138_p10 = pnand %p421_p6, %p137_p9  ;;  %p486_p11 = scmp.eq.s32.totalorder %s419_s18, 0 }
   0xf   : > { %s154_s28 = sshll.u32 %s799_s2, 4  ;;  %s656_s29 = smov [#allocation2]   ;;  %s155_s28 = int_to_ptr.hbm [resolvable:$true] %s154_s28 }
  0x10   : > { %p478_p12 = pneg %p138_p10  ;;  %s156_s30 = sshll.u32 %s656_s29, 4  ;;  %s157_s30 = int_to_ptr.vmem [resolvable:$true] %s156_s30 }
  0x11   : > { %s657_s4 = smov 128   ;;  %s658_s5 = smov 8  }
  0x12   : > { %p479_p13 = pnand %p486_p11, %p478_p12  ;;  %185 = sbr.rel (%p138_p10) target bundleno = 181 (0xb5), region = 32 }
  0x14   : > { %481 = dma.hbm_to_vmem [thread:$0]  (!%p479_p13), %s155_s28, 512, %s157_s30, [#allocation3], %s657_s4, %s657_s4, %s658_s5  }
  0x17   : > { %625 = dma.done.wait (%p486_p11), [#allocation3], 512  }
  0x18   : > { %627 = vsyncadd (%p486_p11), [#allocation3], 4294966784  ;;  %p215_p0 = scmp.lt.s32.totalorder %s646_s15, 1  ;;  %v466_v0 = vld [vmem:[%s798_s1 + $0x18] sm:$0xff]  ;;  %v465_v1 = vld [vmem:[%s798_s1 + $0x10] sm:$0xff]  ;;  %vm277_vm0 = vcmask 523264  }
  0x19   : > { %288 = vmatpush.bf16.msra.mxu0 %v466_v0  ;;  %468 = vmatpush.bf16.msra.mxu1 %v466_v0  ;;  %v464_v2 = vld [vmem:[%s798_s1 + $0x8] sm:$0xff]  ;;  %v463_v3 = vld [vmem:[%s798_s1] sm:$0xff]  ;;  %s211_s29 = sand.u32 1, %s638_s13   ;;  %v241_v7 = vld [vmem:[#allocation2 + $0x10] sm:$0xff]  ;;  %vm303_vm1 = vcmask 261120   ;;  %s467_s4 = sshll.u32 %s646_s15, 5 }
  0x1a   : > { %s216_s10 = scalar_select %p215_p0, %s646_s15, 1  ;;  %v239_v6 = vld [vmem:[#allocation2] sm:$0xff]  ;;  %v240_v12 = vld [vmem:[#allocation2 + $0x8] sm:$0xff]  ;;  %v242_v13 = vld [vmem:[#allocation2 + $0x18] sm:$0xff] }
  0x1b   : > { %s426_s30 = sshll.u32 %s211_s29, 5  ;;  %s322_s8 = scalar_lea.hbm %s800_s3, %s467_s4 }
  0x1c   : > { %s460_s19 = sshll.u32 %s216_s10, 4  ;;  %s213_s5 = scalar_lea.vmem [#allocation5], %s426_s30 }
  0x1d   : > { %289 = vmatpush.bf16.msra.mxu0 %v465_v1  ;;  %469 = vmatpush.bf16.msra.mxu1 %v465_v1  ;;  %s222_s28 = scalar_lea.vmem %s797_s0, %s460_s19  ;;  %s323_s9 = sshll.u32 %s213_s5, 4  ;;  %s324_s9 = int_to_ptr.vmem [resolvable:$true] %s323_s9 }
  0x1e   : > { %v461_v4 = vld [vmem:[%s222_s28] sm:$0xff]  ;;  %v462_v5 = vld [vmem:[%s222_s28 + $0x8] sm:$0xff]  ;;  %s325_s10 = sshll.u32 %s322_s8, 4  ;;  %s309_s15 = scalar_lea.sflag [#allocation4], %s211_s29  ;;  %s326_s10 = int_to_ptr.hbm [resolvable:$true] %s325_s10 }
  0x1f   : > { %s586_s11 = sshra.s32 %s326_s10, 4  ;;  %s592_s23 = scalar_lea.hbm %s800_s3, 64  ;;  %s587_s11 = int_to_ptr.hbm [resolvable:$true] %s586_s11 }
  0x20   : > { %s588_s18 = scalar_lea.hbm %s587_s11, 32  ;;  %p593_p5 = scmp.lt.s32.totalorder %s587_s11, %s800_s3 }
  0x21   : > { %290 = vmatpush.bf16.msra.mxu0 %v464_v2  ;;  %470 = vmatpush.bf16.msra.mxu1 %v464_v2  ;;  %p589_p1 = scmp.ne.s32.totalorder %s587_s11, %s588_s18  ;;  %p594_p6 = scmp.lt.s32.totalorder %s592_s23, %s588_s18 }
  0x23   : > { %p590_p2 = pnand %p589_p1, %p721_p4  ;;  %p595_p7 = por %p594_p6, %p593_p5 }
  0x25   : > { %291 = vmatpush.bf16.msra.mxu0 %v463_v3  ;;  %471 = vmatpush.bf16.msra.mxu1 %v463_v3  ;;  %p591_p3 = pneg %p590_p2 }
  0x27   : > { %p596_p9 = pnand %p595_p7, %p591_p3 }
  0x28   : > { %453 = vmatmul.msk.bf16.vlgmr.msra.gmra.mxu0 %vm277_vm0, %v461_v4  ;;  %454 = vmatmul.msk.bf16.vlgmr.msra.gmra.mxu1 %vm277_vm0, %v462_v5 }
  0xa5   : > { %v293_v8 = vpop.f32.mrf.mxu0  ;;  %v298_v9 = vpop.f32.mrf.mxu1 }
  0xa6   : > { %v294_v10 = vadd.f32 %v293_v8, %v239_v6  ;;  %v299_v11 = vadd.f32 %v298_v9, %v241_v7 }
  0xa8   : > { %304 = vst.msk [vmem:[%s213_s5] sm:$0xff] %vm303_vm1, %v294_v10 }
  0xa9   : > { %306 = vst.msk [vmem:[%s213_s5 + $0x10] sm:$0xff] %vm303_vm1, %v299_v11 }
  0xad   : > { %v295_v14 = vpop.f32.mrf.mxu0  ;;  %v300_v15 = vpop.f32.mrf.mxu1 }
  0xae   : > { %v296_v16 = vadd.f32 %v295_v14, %v240_v12  ;;  %v301_v17 = vadd.f32 %v300_v15, %v242_v13 }
  0xb0   : > { %305 = vst.msk [vmem:[%s213_s5 + $0x8] sm:$0xff] %vm303_vm1, %v296_v16 }
  0xb1   : > { %307 = vst.msk [vmem:[%s213_s5 + $0x18] sm:$0xff] %vm303_vm1, %v301_v17 }
  0xb2   : > { %599 = shalt.err (!%p596_p9)
}
  0xb3   : > { %s659_s28 = smov 128   ;;  %s660_s29 = smov 8  }
  0xb4   : > { %476 = dma.vmem_to_hbm [thread:$0]  (%p721_p4), %s324_s9, 512, %s326_s10, %s309_s15, %s659_s28, %s659_s28, %s660_s29  }
  0xb5 PF: > { %p488_p10 = scmp.ge.s32.totalorder %s654_s17, 2  ;;  %s340_s30 = sand.u32 1, %s634_s12  }
  0xb6   : > { %s341_s4 = scalar_lea.sflag [#allocation4], %s340_s30 }
  0xb7   : > { %p483_p11 = pnand %p488_p10, %p728_p8 }
  0xb9   : > { %p484_p12 = pneg %p483_p11 }
  0xbb   : > { %629 = dma.done.wait (%p484_p12), %s341_s4, 512  }
  0xbc   : > { %631 = vsyncadd (%p484_p12), %s341_s4, 4294966784  ;;  %s17_s17 = sadd.s32 1, %s654_s17   ;;  %s803_s12 = smov %s638_s13 }
  0xbd   : > { %p14_p13 = scmp.ge.s32.totalorder %s17_s17, 4   ;;  %s804_s13 = smov %s642_s14 }
  0xbe   : > { %s805_s14 = smov %s734_s25  ;;  %s806_s15 = smov %s650_s16 }
  0xbf   : > { %s807_s16 = smov %s809_s20  ;;  %16 = sbr.rel (!%p14_p13) target bundleno = 5 (0x5), region = 73 }
  0xc4   :  { %347 = vsyncpa [#allocation3], 1 }
  0xc5   :  { %349 = vsyncpa [#allocation3 + $0x1], 1 }
  0xc6   :  { %350 = vsyncpa [#allocation4], 1 }
  0xc7   :  { %352 = vsyncpa [#allocation4 + $0x1], 1 }

</bundles_post_ra>
